<compile_context>
chip_gen: v7x
topology: tpu7x:2x2x1
jax: 0.10.0
libtpu: 0.0.40
codegen_flags: <defaults>
</compile_context>

<pallas_src>
import functools

import jax
import jax.numpy as jnp
from jax.experimental import pallas as pl
from jax.experimental.pallas import tpu as pltpu


def _make_kernel(split, has_fold, compute_dtype):
    """split = pack*output_dim. z columns [:split] = layer0 path, [split:] = skip path."""
    if has_fold:
        def kernel(x_ref, wbig_ref, bbig_ref, wfold_ref, o_ref):
            x = x_ref[...].astype(compute_dtype)          # f32 -> bf16 in-VMEM
            z = jnp.dot(x, wbig_ref[...],
                        preferred_element_type=jnp.float32) + bbig_ref[...]
            h = jnp.maximum(z[:, :split], 0.0)             # relu(layer0(x)), packed
            skip = z[:, split:]                            # skip(x) + folded bias, packed
            y = jnp.dot(h.astype(compute_dtype), wfold_ref[...],
                        preferred_element_type=jnp.float32)
            o_ref[...] = (y + skip).astype(o_ref.dtype)    # 128-lane unmasked store
    else:
        def kernel(x_ref, wbig_ref, bbig_ref, o_ref):
            x = x_ref[...].astype(compute_dtype)
            z = jnp.dot(x, wbig_ref[...],
                        preferred_element_type=jnp.float32) + bbig_ref[...]
            h = jnp.maximum(z[:, :split], 0.0)
            o_ref[...] = (h + z[:, split:]).astype(o_ref.dtype)
    return kernel


def prepare_params(params, *, compute_dtype=jnp.bfloat16):
    """One-time parameter preprocessing (hoisted out of the per-call hot path).

    * Folds the affine-only hidden chain (layers 1..L-1) into a single (D, D)
      weight + bias (valid because the module keeps only one ReLU).
    * Fuses layer0 and skip into one x-path matmul (concatenated N); the folded
      bias is absorbed into the skip bias.
    * Packs `pack = 128 // output_dim` batch rows per 128-lane row using
      block-diagonal (kron) weights so kernel loads/stores are lane-dense.
    * Casts matmul operands to bf16 once; biases stay f32.
    Returns a dict of device arrays + static config; reuse it across forward calls.
    """
    w0, b0, wh, bh, ws, bs = (params["w0"], params["b0"], params["wh"],
                              params["bh"], params["ws"], params["bs"])
    input_dim, output_dim = int(w0.shape[0]), int(w0.shape[1])
    num_hidden = int(wh.shape[0])

    # Fold the affine hidden chain in f32:  y = h @ W_fold + b_fold.
    w_fold = jnp.eye(output_dim, dtype=jnp.float32)
    b_fold = jnp.zeros((1, output_dim), jnp.float32)
    for i in range(num_hidden):        # static Python loop, runs once here
        w_fold = w_fold @ wh[i]
        b_fold = b_fold @ wh[i] + bh[i]

    # Lane-packing factor: pack batch rows so the packed output width is 128 lanes.
    pack = 128 // output_dim if (output_dim < 128 and 128 % output_dim == 0) else 1
    eye_p = jnp.eye(pack, dtype=jnp.float32)

    # Block-diagonal expansion keeps per-row math exact (zero blocks contribute 0).
    w0_big = jnp.kron(eye_p, w0)                        # (pack*in, pack*out)
    ws_big = jnp.kron(eye_p, ws)
    w_big = jnp.concatenate([w0_big, ws_big], axis=1)   # (pack*in, 2*pack*out)
    b_big = jnp.concatenate([jnp.tile(b0, (1, pack)),
                             jnp.tile(bs + b_fold, (1, pack))], axis=1)

    return {
        "w_big": w_big.astype(compute_dtype),
        "b_big": b_big.astype(jnp.float32),
        "w_fold_big": (jnp.kron(eye_p, w_fold).astype(compute_dtype)
                       if num_hidden > 0 else None),
        "pack": pack,
        "input_dim": input_dim,
        "output_dim": output_dim,
        "has_fold": num_hidden > 0,
        "compute_dtype": compute_dtype,
    }


def block_resmlp_forward(x, prepared, *, tile_rows=None):
    """x: [B, input_dim] float32.  prepared: output of prepare_params (reused)."""
    pack = prepared["pack"]
    input_dim = prepared["input_dim"]
    output_dim = prepared["output_dim"]
    has_fold = prepared["has_fold"]
    compute_dtype = prepared["compute_dtype"]

    B = x.shape[0]
    assert x.shape[1] == input_dim
    split = pack * output_dim                      # lane width of each half of z

    # ---- batch tiling over packed rows --------------------------------------
    rows = pl.cdiv(B, pack)
    if tile_rows is None:
        # Single grid step for small/medium batches (v5e/v6e are single-TC, so
        # extra steps are pure ~0.35us/step overhead).  For v7x megacore at
        # large B, pass tile_rows = rows // 2 for exactly two parallel steps.
        tile_rows = rows if rows <= 2048 else 1024
    tile_rows = max(8, min(int(tile_rows), rows))
    tile_rows = ((tile_rows + 7) // 8) * 8         # sublane-aligned second-minor dim
    num_steps = pl.cdiv(rows, tile_rows)
    rows_pad = num_steps * tile_rows
    b_pad = rows_pad * pack

    if b_pad != B:                                 # ragged tail: pad-and-slice
        x = jnp.pad(x, ((0, b_pad - B), (0, 0)))
    xp = x.reshape(rows_pad, pack * input_dim)     # free row-major reshape

    kernel = _make_kernel(split, has_fold, compute_dtype)

    in_specs = [
        pl.BlockSpec((tile_rows, pack * input_dim), lambda i: (i, 0)),   # packed x tile
        pl.BlockSpec((pack * input_dim, 2 * split), lambda i: (0, 0)),   # blockdiag [w0|ws]
        pl.BlockSpec((1, 2 * split), lambda i: (0, 0)),                  # fused bias
    ]
    operands = [xp, prepared["w_big"], prepared["b_big"]]
    if has_fold:
        in_specs.append(pl.BlockSpec((split, split), lambda i: (0, 0)))  # blockdiag W_fold
        operands.append(prepared["w_fold_big"])

    out = pl.pallas_call(
        kernel,
        out_shape=jax.ShapeDtypeStruct((rows_pad, split), jnp.float32),
        grid_spec=pltpu.PrefetchScalarGridSpec(
            num_scalar_prefetch=0,
            grid=(num_steps,),
            in_specs=in_specs,
            out_specs=pl.BlockSpec((tile_rows, split), lambda i: (i, 0)),
        ),
        compiler_params=pltpu.CompilerParams(
            dimension_semantics=("parallel",)),
    )(*operands)

    # Unpack lanes back to [B, output_dim]; the slice drops the ragged-tail pad.
    return out.reshape(b_pad, output_dim)[:B]


def init_params(key, input_dim, output_dim, num_layers):
    """Deterministic synthetic init (PyTorch-Linear-like uniform fan-in)."""
    num_hidden = num_layers - 1
    keys = jax.random.split(key, 6)

    def uni(k, shape, fan_in):
        bound = 1.0 / jnp.sqrt(fan_in)
        return jax.random.uniform(k, shape, jnp.float32, -bound, bound)

    return {
        "w0": uni(keys[0], (input_dim, output_dim), input_dim),
        "b0": uni(keys[1], (1, output_dim), input_dim),
        "wh": uni(keys[2], (num_hidden, output_dim, output_dim), output_dim),
        "bh": uni(keys[3], (num_hidden, 1, output_dim), output_dim),
        "ws": uni(keys[4], (input_dim, output_dim), input_dim),
        "bs": uni(keys[5], (1, output_dim), input_dim),
    }


def reference_forward(x, params):
    """Pure-jnp reference reproducing the PyTorch module's effective forward."""
    y = jnp.maximum(x @ params["w0"] + params["b0"], 0.0)
    for i in range(params["wh"].shape[0]):
        y = y @ params["wh"][i] + params["bh"][i]
    return y + (x @ params["ws"] + params["bs"])


if __name__ == "__main__":
    # block_resmlp(input_dim=16, output_dim=32, num_layers=3, skip_connection=True)
    batch, input_dim, output_dim, num_layers = 256, 16, 32, 3

    key = jax.random.PRNGKey(0)
    kx, kp = jax.random.split(key)
    x = jax.random.normal(kx, (batch, input_dim), jnp.float32)
    params = init_params(kp, input_dim, output_dim, num_layers)

    prepared = prepare_params(params)          # one-time; hoisted out of the hot path
    fwd = jax.jit(lambda xx: block_resmlp_forward(xx, prepared))

    out = jax.block_until_ready(fwd(x))        # pack=4 -> packed rows=64, grid=(1,)

    # Reference computed with the same bf16-rounded matmul operands the kernel
    # uses (x, weights in bf16; biases f32); tolerance also covers the f32
    # rounding-order change from folding the affine hidden chain.
    params_ref = dict(params)
    for k in ("w0", "wh", "ws"):
        params_ref[k] = params[k].astype(jnp.bfloat16).astype(jnp.float32)
    x_ref_in = x.astype(jnp.bfloat16).astype(jnp.float32)
    ref = reference_forward(x_ref_in, params_ref)

    assert out.shape == (batch, output_dim)
    assert jnp.allclose(out, ref, atol=2e-2, rtol=2e-2), "mismatch vs reference"

    print("KERNEL_OK")
</pallas_src>

<mosaic_0001>
module attributes {stable_mosaic.version = 11 : i64} {
  func.func @kernel(%arg0: i32, %arg1: memref<64x64xf32, #tpu.memory_space<vmem>>, %arg2: memref<64x256xbf16, #tpu.memory_space<vmem>>, %arg3: memref<1x256xf32, #tpu.memory_space<vmem>>, %arg4: memref<128x128xbf16, #tpu.memory_space<vmem>>, %arg5: memref<64x128xf32, #tpu.memory_space<vmem>>) attributes {dimension_semantics = [#tpu.dimension_semantics<parallel>], iteration_bounds = array<i64: 1>, scalar_prefetch = 0 : i64, scratch_operands = 0 : i64, tpu.core_type = #tpu.core_type<tc>, window_params = [{transform_indices = @transform_0, window_bounds = array<i64: 64, 64>}, {pipeline_mode = #tpu.pipeline_mode<synchronous>, transform_indices = @transform_1, window_bounds = array<i64: 64, 256>}, {pipeline_mode = #tpu.pipeline_mode<synchronous>, transform_indices = @transform_2, window_bounds = array<i64: 1, 256>}, {pipeline_mode = #tpu.pipeline_mode<synchronous>, transform_indices = @transform_3, window_bounds = array<i64: 128, 128>}, {transform_indices = @transform_4, window_bounds = array<i64: 64, 128>}]} {
    %c0 = arith.constant 0 : index
    %c0_0 = arith.constant 0 : index
    %0 = vector.load %arg1[%c0, %c0_0] : memref<64x64xf32, #tpu.memory_space<vmem>>, vector<64x64xf32>
    %1 = arith.truncf %0 : vector<64x64xf32> to vector<64x64xbf16>
    %c0_1 = arith.constant 0 : index
    %c0_2 = arith.constant 0 : index
    %2 = vector.load %arg2[%c0_1, %c0_2] : memref<64x256xbf16, #tpu.memory_space<vmem>>, vector<64x256xbf16>
    %cst = arith.constant dense<0.000000e+00> : vector<64x256xf32>
    %3 = tpu.matmul %1, %2, %cst {dimension_numbers = #tpu.dot_dimension_numbers<[1], [0], [0], [1], [0, 0, 1, 1], [], []>} : vector<64x64xbf16>, vector<64x256xbf16>, vector<64x256xf32> -> vector<64x256xf32>
    %c0_3 = arith.constant 0 : index
    %c0_4 = arith.constant 0 : index
    %4 = vector.load %arg3[%c0_3, %c0_4] : memref<1x256xf32, #tpu.memory_space<vmem>>, vector<1x256xf32>
    %5 = vector.broadcast %4 : vector<1x256xf32> to vector<64x256xf32>
    %6 = arith.addf %3, %5 : vector<64x256xf32>
    %7 = vector.extract_strided_slice %6 {offsets = [0, 0], sizes = [64, 128], strides = [1, 1]} : vector<64x256xf32> to vector<64x128xf32>
    %cst_5 = arith.constant 0.000000e+00 : f32
    %8 = vector.broadcast %cst_5 : f32 to vector<64x128xf32>
    %9 = arith.maximumf %7, %8 : vector<64x128xf32>
    %10 = vector.extract_strided_slice %6 {offsets = [0, 128], sizes = [64, 128], strides = [1, 1]} : vector<64x256xf32> to vector<64x128xf32>
    %11 = arith.truncf %9 : vector<64x128xf32> to vector<64x128xbf16>
    %c0_6 = arith.constant 0 : index
    %c0_7 = arith.constant 0 : index
    %12 = vector.load %arg4[%c0_6, %c0_7] : memref<128x128xbf16, #tpu.memory_space<vmem>>, vector<128x128xbf16>
    %cst_8 = arith.constant dense<0.000000e+00> : vector<64x128xf32>
    %13 = tpu.matmul %11, %12, %cst_8 {dimension_numbers = #tpu.dot_dimension_numbers<[1], [0], [0], [1], [0, 0, 1, 1], [], []>} : vector<64x128xbf16>, vector<128x128xbf16>, vector<64x128xf32> -> vector<64x128xf32>
    %14 = arith.addf %13, %10 : vector<64x128xf32>
    %c0_9 = arith.constant 0 : index
    %c0_10 = arith.constant 0 : index
    %15 = vector.load %arg5[%c0_9, %c0_10] : memref<64x128xf32, #tpu.memory_space<vmem>>, vector<64x128xf32>
    tpu.vector_store %arg5[%c0_9, %c0_10], %14 {strides = array<i32>} : memref<64x128xf32, #tpu.memory_space<vmem>>, vector<64x128xf32>,
    return
  }
  func.func @transform_0(%arg0: i32) -> (i32, i32) {
    %c0_i32 = arith.constant 0 : i32
    %c0_i32_0 = arith.constant 0 : i32
    return %arg0, %c0_i32 : i32, i32
  }
  func.func @transform_1(%arg0: i32) -> (i32, i32) {
    %c0_i32 = arith.constant 0 : i32
    %c0_i32_0 = arith.constant 0 : i32
    %c0_i32_1 = arith.constant 0 : i32
    return %c0_i32, %c0_i32_0 : i32, i32
  }
  func.func @transform_2(%arg0: i32) -> (i32, i32) {
    %c0_i32 = arith.constant 0 : i32
    %c0_i32_0 = arith.constant 0 : i32
    %c0_i32_1 = arith.constant 0 : i32
    return %c0_i32, %c0_i32_0 : i32, i32
  }
  func.func @transform_3(%arg0: i32) -> (i32, i32) {
    %c0_i32 = arith.constant 0 : i32
    %c0_i32_0 = arith.constant 0 : i32
    %c0_i32_1 = arith.constant 0 : i32
    return %c0_i32, %c0_i32_0 : i32, i32
  }
  func.func @transform_4(%arg0: i32) -> (i32, i32) {
    %c0_i32 = arith.constant 0 : i32
    %c0_i32_0 = arith.constant 0 : i32
    return %arg0, %c0_i32 : i32, i32
  }
}

</mosaic_0001>

<bundles_post_ra>
// kernel: _lambda_.1
= control target key start
LH: loop header
LB: loop body
LE: loop exit
PB: predicated region body
PF: predicated region fallthrough
CT: control target
= control target key end

     0   :  { %v406_v1 = vmov 0   ;;  %vm90_vm0 = vcmask 523264   ;;  %v40_v29 = vlaneseq  ;;  %s535_s1 = inlined_call_operand.vmem [shape: bf16[64,256], index: 1, kind: input, shape index: {}]   ;;  %s536_s3 = inlined_call_operand.vmem [shape: bf16[128,128], index: 3, kind: input, shape index: {}]   ;;  %s537_s0 = inlined_call_operand.vmem [shape: f32[64,64], index: 0, kind: input, shape index: {}]   ;;  %s538_s2 = inlined_call_operand.vmem [shape: f32[1,256], index: 2, kind: input, shape index: {}]   ;;  %s539_s4 = inlined_call_operand.vmem [shape: f32[64,128], index: 4, kind: output, shape index: {}]  }
   0x1   :  { %v386_v0 = vld [vmem:[%s535_s1 + $0x4] ss:$8 sps:$4 sm:$0xff]   ;;  %135 = vmatprep.mubr.bf16.mxu0 %v406_v1  ;;  %v388_v2 = vld [vmem:[%s535_s1] ss:$8 sps:$4 sm:$0xff]   ;;  %v389_v3 = vld [vmem:[%s535_s1 + $0x14] ss:$8 sps:$4 sm:$0xff]  }
   0x2   :  { %103 = vmatprep.subr.bf16.mxu0 %v386_v0  ;;  %v391_v4 = vld [vmem:[%s535_s1 + $0x10] ss:$8 sps:$4 sm:$0xff]   ;;  %v392_v5 = vld [vmem:[%s535_s1 + $0x24] ss:$8 sps:$4 sm:$0xff]   ;;  %v394_v6 = vld [vmem:[%s535_s1 + $0x20] ss:$8 sps:$4 sm:$0xff]  }
   0x3   :  { %104 = vmatpush1.bf16.msra.mxu0 %v388_v2  ;;  %v395_v7 = vld [vmem:[%s535_s1 + $0x34] ss:$8 sps:$4 sm:$0xff]   ;;  %v398_v8 = vld [vmem:[%s536_s3] sm:$0xff]   ;;  %v397_v9 = vld [vmem:[%s535_s1 + $0x30] ss:$8 sps:$4 sm:$0xff]   ;;  %v41_v30 = vshrl.u32 %v40_v29, 7 }
   0x4   :  { %105 = vmatprep.subr.bf16.mxu0 %v389_v3  ;;  %v399_v10 = vld [vmem:[%s536_s3 + $0x8] sm:$0xff]   ;;  %v18_v11 = vld [vmem:[%s537_s0] sm:$0xff]  ;;  %361 = vmatprep.subr.bf16.mxu1 %v398_v8  ;;  %v400_v13 = vld [vmem:[%s536_s3 + $0x10] sm:$0xff]  }
   0x5   :  { %v19_v12 = vld [vmem:[%s537_s0 + $0x8] sm:$0xff]  ;;  %362 = vmatpush3.bf16.msra.mxu1 %v398_v8  ;;  %v401_v15 = vld [vmem:[%s536_s3 + $0x18] sm:$0xff]   ;;  %v20_v16 = vld [vmem:[%s537_s0 + $0x10] sm:$0xff]  ;;  %v42_v31 = vsub.s32 0, %v41_v30 }
   0x6   :  { %363 = vmatprep.subr.bf16.mxu1 %v399_v10  ;;  %v26_v14 = vpack.c.bf16 %v19_v12, %v18_v11  ;;  %v21_v17 = vld [vmem:[%s537_s0 + $0x18] sm:$0xff]  ;;  %v22_v19 = vld [vmem:[%s537_s0 + $0x20] sm:$0xff]  ;;  %v23_v20 = vld [vmem:[%s537_s0 + $0x28] sm:$0xff] }
   0x7   :  { %106 = vmatpush1.bf16.msra.mxu0 %v391_v4  ;;  %v27_v18 = vpack.c.bf16 %v21_v17, %v20_v16  ;;  %v28_v21 = vpack.c.bf16 %v23_v20, %v22_v19  ;;  %v24_v22 = vld [vmem:[%s537_s0 + $0x30] sm:$0xff]  ;;  %v25_v23 = vld [vmem:[%s537_s0 + $0x38] sm:$0xff]  ;;  %v402_v25 = vld [vmem:[%s536_s3 + $0x20] sm:$0xff]  }
   0x8   :  { %107 = vmatprep.subr.bf16.mxu0 %v392_v5  ;;  %v29_v24 = vpack.c.bf16 %v25_v23, %v24_v22  ;;  %v403_v26 = vld [vmem:[%s536_s3 + $0x28] sm:$0xff]   ;;  %v404_v27 = vld [vmem:[%s536_s3 + $0x30] sm:$0xff]   ;;  %v405_v28 = vld [vmem:[%s536_s3 + $0x38] sm:$0xff]  }
   0x9   :  { %364 = vmatpush3.bf16.msra.mxu1 %v399_v10  ;;  %v38_v32 = vld [vmem:[%s538_s2] sm:$0x3] }
   0xa   :  { %365 = vmatprep.subr.bf16.mxu1 %v400_v13  ;;  %v43_v33 = vrot.slane %v38_v32, %v42_v31 }
   0xb   :  { %108 = vmatpush1.bf16.msra.mxu0 %v394_v6  ;;  %v46_v6 = vsub.s32 1, %v41_v30 }
   0xc   :  { %109 = vmatprep.subr.bf16.mxu0 %v395_v7 }
   0xd   :  { %366 = vmatpush3.bf16.msra.mxu1 %v400_v13  ;;  %v47_v7 = vrot.slane %v38_v32, %v46_v6 }
   0xe   :  { %367 = vmatprep.subr.bf16.mxu1 %v401_v15 }
   0xf   :  { %110 = vmatpush1.bf16.msra.mxu0 %v397_v9 }
  0x11   :  { %368 = vmatpush3.bf16.msra.mxu1 %v401_v15 }
  0x12   :  { %337 = vmatmul.mubr.msk.bf16.vlgmr.msra.gmra.mrb[0].mxu0 %vm90_vm0, %v26_v14  ;;  %369 = vmatprep.subr.bf16.mxu1 %v402_v25 }
  0x13   :  { %145 = vmatprep.mubr.bf16.mxu0 %v406_v1 }
  0x15   :  { %370 = vmatpush3.bf16.msra.mxu1 %v402_v25 }
  0x16   :  { %371 = vmatprep.subr.bf16.mxu1 %v403_v26 }
  0x19   :  { %372 = vmatpush3.bf16.msra.mxu1 %v403_v26 }
  0x1a   :  { %338 = vmatmul.mubr.msk.bf16.gmra.mrb[4].mxu0 %vm90_vm0, %v27_v18  ;;  %373 = vmatprep.subr.bf16.mxu1 %v404_v27 }
  0x1b   :  { %155 = vmatprep.mubr.bf16.mxu0 %v406_v1 }
  0x1d   :  { %374 = vmatpush3.bf16.msra.mxu1 %v404_v27 }
  0x1e   :  { %375 = vmatprep.subr.bf16.mxu1 %v405_v28 }
  0x21   :  { %376 = vmatpush3.bf16.msra.mxu1 %v405_v28 }
  0x22   :  { %339 = vmatmul.mubr.msk.bf16.gmra.mrb[8].mxu0 %vm90_vm0, %v28_v21 }
  0x23   :  { %165 = vmatprep.mubr.bf16.mxu0 %v406_v1 }
  0x2a   :  { %340 = vmatmul.mubr.msk.bf16.gmra.mrb[12].mxu0 %vm90_vm0, %v29_v24 }
  0xe5   :  { %v137_v34 = vpop.f32.mrb[0].mxu0 }
  0xe6   :  { %v138_v35 = vadd.f32 %v137_v34, %v43_v33  ;;  %v139_v36 = vpop.f32.mrb[1].mxu0 }
  0xe7   :  { %v141_v37 = vpop.f32.mrb[2].mxu0  ;;  %v140_v9 = vadd.f32 %v139_v36, %v47_v7 }
  0xe8   :  { %v142_v38 = vadd.f32 %v141_v37, %v43_v33  ;;  %v143_v39 = vpop.f32.mrb[3].mxu0  ;;  %v176_v40 = vmax.f32 %v138_v35, 0.0 }
  0xe9   :  { %v144_v14 = vadd.f32 %v143_v39, %v47_v7 }
  0xea   :  { %v177_v41 = vmax.f32 %v142_v38, 0.0 }
  0xec   :  { %v184_v42 = vpack.c.bf16 %v177_v41, %v176_v40 }
  0xed   :  { %v147_v43 = vpop.f32.mrb[4].mxu0 }
  0xee   :  { %v148_v44 = vadd.f32 %v147_v43, %v43_v33  ;;  %v149_v45 = vpop.f32.mrb[5].mxu0  ;;  %377 = vmatprep.mubr.bf16.mxu1 %v184_v42 }
  0xef   :  { %v151_v46 = vpop.f32.mrb[6].mxu0  ;;  %v150_v8 = vadd.f32 %v149_v45, %v47_v7 }
  0xf0   :  { %v152_v47 = vadd.f32 %v151_v46, %v43_v33  ;;  %v153_v48 = vpop.f32.mrb[7].mxu0  ;;  %v178_v49 = vmax.f32 %v148_v44, 0.0 }
  0xf1   :  { %v154_v11 = vadd.f32 %v153_v48, %v47_v7 }
  0xf2   :  { %v179_v50 = vmax.f32 %v152_v47, 0.0 }
  0xf4   :  { %v185_v51 = vpack.c.bf16 %v179_v50, %v178_v49 }
  0xf5   :  { %v157_v52 = vpop.f32.mrb[8].mxu0 }
  0xf6   :  { %v158_v53 = vadd.f32 %v157_v52, %v43_v33  ;;  %v159_v54 = vpop.f32.mrb[9].mxu0  ;;  %378 = vmatmul.mubr.bf16.vlgmr.msra.gmra.mrb[0].mxu1 %v185_v51 }
  0xf7   :  { %v161_v55 = vpop.f32.mrb[10].mxu0  ;;  %v160_v21 = vadd.f32 %v159_v54, %v47_v7 }
  0xf8   :  { %v162_v56 = vadd.f32 %v161_v55, %v43_v33  ;;  %v163_v57 = vpop.f32.mrb[11].mxu0  ;;  %v180_v58 = vmax.f32 %v158_v53, 0.0 }
  0xf9   :  { %v164_v26 = vadd.f32 %v163_v57, %v47_v7 }
  0xfa   :  { %v181_v59 = vmax.f32 %v162_v56, 0.0 }
  0xfc   :  { %v186_v60 = vpack.c.bf16 %v181_v59, %v180_v58 }
  0xfd   :  { %v167_v61 = vpop.f32.mrb[12].mxu0 }
  0xfe   :  { %v168_v62 = vadd.f32 %v167_v61, %v43_v33  ;;  %v169_v63 = vpop.f32.mrb[13].mxu0  ;;  %381 = vmatprep.mubr.bf16.mxu1 %v186_v60 }
  0xff   :  { %v171_v0 = vpop.f32.mrb[14].mxu0  ;;  %v170_v20 = vadd.f32 %v169_v63, %v47_v7 }
 0x100   :  { %v172_v1 = vadd.f32 %v171_v0, %v43_v33  ;;  %v173_v2 = vpop.f32.mrb[15].mxu0  ;;  %v182_v3 = vmax.f32 %v168_v62, 0.0 }
 0x101   :  { %v174_v23 = vadd.f32 %v173_v2, %v47_v7 }
 0x102   :  { %v183_v4 = vmax.f32 %v172_v1, 0.0 }
 0x104   :  { %v187_v5 = vpack.c.bf16 %v183_v4, %v182_v3 }
 0x106   :  { %382 = vmatmul.mubr.bf16.gmra.mrb[4].mxu1 %v187_v5 }
 0x1c9   :  { %v379_v10 = vpop.f32.mrb[0].mxu1 }
 0x1ca   :  { %v295_v12 = vadd.f32 %v379_v10, %v150_v8  ;;  %v286_v13 = vpop.f32.mrb[1].mxu1 }
 0x1cb   :  { %v287_v15 = vadd.f32 %v286_v13, %v140_v9  ;;  %v380_v16 = vpop.f32.mrb[2].mxu1 }
 0x1cc   :  { %319 = vst [vmem:[%s539_s4 + $0x10] sm:$0xff] %v295_v12  ;;  %v298_v17 = vadd.f32 %v380_v16, %v154_v11  ;;  %v289_v18 = vpop.f32.mrb[3].mxu1 }
 0x1cd   :  { %317 = vst [vmem:[%s539_s4] sm:$0xff] %v287_v15  ;;  %v290_v19 = vadd.f32 %v289_v18, %v144_v14 }
 0x1ce   :  { %320 = vst [vmem:[%s539_s4 + $0x18] sm:$0xff] %v298_v17 }
 0x1cf   :  { %318 = vst [vmem:[%s539_s4 + $0x8] sm:$0xff] %v290_v19 }
 0x1d9   :  { %v383_v22 = vpop.f32.mrb[4].mxu1 }
 0x1da   :  { %v311_v24 = vadd.f32 %v383_v22, %v170_v20  ;;  %v302_v25 = vpop.f32.mrb[5].mxu1 }
 0x1db   :  { %v303_v27 = vadd.f32 %v302_v25, %v160_v21  ;;  %v384_v28 = vpop.f32.mrb[6].mxu1 }
 0x1dc   :  { %323 = vst [vmem:[%s539_s4 + $0x30] sm:$0xff] %v311_v24  ;;  %v314_v29 = vadd.f32 %v384_v28, %v174_v23  ;;  %v305_v30 = vpop.f32.mrb[7].mxu1 }
 0x1dd   :  { %321 = vst [vmem:[%s539_s4 + $0x20] sm:$0xff] %v303_v27  ;;  %v306_v31 = vadd.f32 %v305_v30, %v164_v26 }
 0x1de   :  { %324 = vst [vmem:[%s539_s4 + $0x38] sm:$0xff] %v314_v29 }
 0x1df   :  { %322 = vst [vmem:[%s539_s4 + $0x28] sm:$0xff] %v306_v31 }

</bundles_post_ra>
